<compile_context>
chip_gen: v6e
topology: v6e:2x2x1
jax: 0.10.0
libtpu: 0.0.40
codegen_flags: <defaults>
</compile_context>

<pallas_src>
import jax
import jax.numpy as jnp
from jax.experimental import pallas as pl
from jax.experimental.pallas import tpu as pltpu

# ---------------- config ----------------
STATE_DIM = 32
NODE_BIAS_SIZE = 8
ANNOTATION_DIM = 2
NODETYPE_DIM = 3
H_DIM = 32                      # importance_out_net_h_size
NUM_LAYERS = 2                  # importance_out_net_num_layer
N_TOTAL_NODES = 16              # n_total_nodes == opt.vocab_size
EMB_ROWS = N_TOTAL_NODES + 1    # extra row = "novel" embedding

IN_REAL = STATE_DIM + EMB_ROWS + ANNOTATION_DIM + NODETYPE_DIM  # 54 (one-hot-folded width)
IN_PAD = 64                     # padded K for the fused layer-1 matmul
W1_ROWS = IN_PAD                # 64 rows of the bf16 slab = fused layer-1 weights
W_ROWS = W1_ROWS + H_DIM        # 96 rows total: [w1_fused | w2]
F_ROWS = 16                     # f32 slab rows: b1, b2, bo, and wo (padded to 8 rows) at 8:16


def _round_up(v, m):
    return ((v + m - 1) // m) * m


# ---------------- fused Pallas kernel ----------------
def importance_kernel(idx_ref, x_ref, ann_ref, nt_ref, wslab_ref, fslab_ref, out_ref):
    bf16 = jnp.bfloat16
    tm = x_ref.shape[0]

    # --- constant slabs (static slices; VMEM-resident across grid steps) ---
    w1 = wslab_ref[0:W1_ROWS, :]                  # (64, H) bf16: [x | emb@w1 | ann | nt | 0-pad]
    w2 = wslab_ref[W1_ROWS:W_ROWS, :]             # (H, H)  bf16
    b1 = fslab_ref[0:1, :]                        # (1, H)  f32
    b2 = fslab_ref[1:2, :]                        # (1, H)  f32
    bo = fslab_ref[2:3, 0:1]                      # (1, 1)  f32
    wo_pad = fslab_ref[8:16, :]                   # (8, H)  f32, row 0 = output weights, rest 0

    # --- node-bias embedding folded into layer 1 via a one-hot matmul ---
    # idx >= vocab_size -> novel row (row N_TOTAL_NODES).
    # TODO(synk): negative indices are clamped to 0 here; PyTorch nn.Embedding would raise.
    idx = jnp.clip(idx_ref[...], 0, N_TOTAL_NODES)                       # (tm, 1) int32
    rows = jax.lax.broadcasted_iota(jnp.int32, (tm, EMB_ROWS), 1)
    onehot = (rows == idx).astype(jnp.float32)                           # (tm, 17)

    # --- fused layer-1 input: single (tm, 64) slab -> one bf16 MXU matmul ---
    joined = jnp.concatenate(
        [x_ref[...],                                                      # 32
         onehot,                                                          # 17
         ann_ref[...],                                                    # 2
         nt_ref[...],                                                     # 3
         jnp.zeros((tm, IN_PAD - IN_REAL), jnp.float32)],                 # 10 zero pad
        axis=-1).astype(bf16)                                             # (tm, 64)

    h = jnp.dot(joined, w1, preferred_element_type=jnp.float32) + b1
    h = jnp.maximum(h, 0.0)

    # layer 2: Linear(H, H) + ReLU (bf16 operands, f32 accumulation)
    h = jnp.dot(h.astype(bf16), w2, preferred_element_type=jnp.float32) + b2
    h = jnp.maximum(h, 0.0)                                               # (tm, H) f32

    # --- output_linear (H -> 1), lane-dense epilogue ---
    # (8,H) @ (tm,H)^T on the MXU -> (8, tm); row 0 holds the logits laid out
    # along lanes, so bias/tanh/store run on dense vregs and the store is a full vst.
    o8 = jnp.einsum('oh,nh->on', wo_pad, h, preferred_element_type=jnp.float32)
    o = o8[0:1, :] + bo                                                   # (1, tm)

    # 'sigout': sigmoid(o) == 0.5*(tanh(o/2)+1)  (numerically stable, EUP)
    out_ref[...] = 0.5 * (jnp.tanh(0.5 * o) + 1.0)


def run_importance_mlp(idx2d, x, ann, nt, fp, *, tm_max=2048):
    n = x.shape[0]
    n_lane = _round_up(max(n, 1), 128)      # lane-dense output -> tile multiple of 128
    tm = min(tm_max, n_lane)
    # v7x has 2 TensorCores: keep >= 2 grid steps when there is enough work so
    # the "parallel" node axis can actually be sharded across both cores.
    if n_lane > 128 and n_lane // tm < 2:
        tm = _round_up(pl.cdiv(n_lane, 2), 128)
    n_pad = _round_up(n_lane, tm)
    grid = (n_pad // tm,)

    def pad_rows(a):
        if a.shape[0] == n_pad:
            return a
        return jnp.pad(a, ((0, n_pad - a.shape[0]), (0, 0)))

    idx2d, x, ann, nt = pad_rows(idx2d), pad_rows(x), pad_rows(ann), pad_rows(nt)

    def row_spec(d):
        return pl.BlockSpec((tm, d), lambda i: (i, 0))

    def const_spec(shape):
        # constant block index -> weight slabs stay VMEM-resident across grid steps
        return pl.BlockSpec(shape, lambda i: (0, 0))

    out = pl.pallas_call(
        importance_kernel,
        out_shape=jax.ShapeDtypeStruct((1, n_pad), jnp.float32),   # lane-dense output slab
        grid=grid,
        in_specs=[
            row_spec(1),                       # node indices (int32)
            row_spec(STATE_DIM),               # x
            row_spec(ANNOTATION_DIM),          # ann
            row_spec(NODETYPE_DIM),            # nodetype
            const_spec((W_ROWS, H_DIM)),       # bf16 weight slab [w1_fused | w2]
            const_spec((F_ROWS, H_DIM)),       # f32 slab [b1, b2, bo, wo_pad8]
        ],
        out_specs=pl.BlockSpec((1, tm), lambda i: (0, i)),
        compiler_params=pltpu.CompilerParams(
            dimension_semantics=("parallel",),
            vmem_limit_bytes=32 * 1024 * 1024),
    )(idx2d, x, ann, nt, fp["wslab"], fp["fslab"])
    return out.reshape(n_pad, 1)[:n]


# ---------------- forward wrapper ----------------
def importance_net_forward(folded_params, x, node_input, ann_input, nodetype_input):
    # TODO(synk): 'gated'/'gatedsig' branches reference self.linear_gate which is
    # never registered in __init__ (would raise in PyTorch); only 'sigout' built.
    idx2d = node_input.astype(jnp.int32).reshape(-1, 1)
    return run_importance_mlp(
        idx2d,
        x.astype(jnp.float32),
        ann_input.astype(jnp.float32),
        nodetype_input.astype(jnp.float32),
        folded_params)


# ---------------- parameters ----------------
def init_params(key):
    ks = jax.random.split(key, 8)

    def lin(kw, kb, fan_in, fan_out):
        bound = 1.0 / jnp.sqrt(fan_in)
        w = jax.random.uniform(kw, (fan_in, fan_out), jnp.float32, -bound, bound)
        b = jax.random.uniform(kb, (1, fan_out), jnp.float32, -bound, bound)
        return w, b

    in_dim = STATE_DIM + NODE_BIAS_SIZE + ANNOTATION_DIM + NODETYPE_DIM   # 45
    w1, b1 = lin(ks[0], ks[1], in_dim, H_DIM)
    w2, b2 = lin(ks[2], ks[3], H_DIM, H_DIM)
    wo, bo = lin(ks[4], ks[5], H_DIM, 1)
    emb_table = jax.random.normal(ks[6], (N_TOTAL_NODES, NODE_BIAS_SIZE), jnp.float32)
    emb_novel = jax.random.normal(ks[7], (1, NODE_BIAS_SIZE), jnp.float32)
    return dict(w1=w1, b1=b1, w2=w2, b2=b2, wo=wo, bo=bo,
                emb_table=emb_table, emb_novel=emb_novel)


def fold_params(p):
    """One-time fold: pre-multiply the embedding table (+ novel row) by its w1
    slice, fuse all layer-1 weight blocks into one zero-padded (64, H) matrix,
    and pack everything into two const slabs (bf16 weights, f32 biases/wo)."""
    bf16 = jnp.bfloat16
    w1 = p["w1"]
    o0 = STATE_DIM
    o1 = STATE_DIM + NODE_BIAS_SIZE
    o2 = o1 + ANNOTATION_DIM
    emb_all = jnp.concatenate([p["emb_table"], p["emb_novel"]], axis=0)   # (17, 8)
    emb_w1 = emb_all @ w1[o0:o1]                                          # (17, H)
    w1_fused = jnp.concatenate(
        [w1[:o0],                                     # x rows        (32)
         emb_w1,                                      # one-hot rows  (17)
         w1[o1:o2],                                   # ann rows      (2)
         w1[o2:],                                     # nodetype rows (3)
         jnp.zeros((IN_PAD - IN_REAL, H_DIM), jnp.float32)],  # pad   (10)
        axis=0)                                                            # (64, H)
    wslab = jnp.concatenate([w1_fused, p["w2"]], axis=0).astype(bf16)      # (96, H) bf16

    fslab = jnp.zeros((F_ROWS, H_DIM), jnp.float32)
    fslab = fslab.at[0, :].set(p["b1"][0])            # row 0: b1
    fslab = fslab.at[1, :].set(p["b2"][0])            # row 1: b2
    fslab = fslab.at[2, 0].set(p["bo"][0, 0])         # row 2, lane 0: bo
    fslab = fslab.at[8, :].set(p["wo"][:, 0])         # rows 8:16: wo (row 8), rest 0
    return dict(wslab=wslab, fslab=fslab)


# ---------------- pure-JAX reference (f32) ----------------
def reference_forward(p, x, node_input, ann_input, nodetype_input):
    idx = node_input.astype(jnp.int32)
    emb = p["emb_table"][jnp.clip(idx, 0, N_TOTAL_NODES - 1)]
    novel = jnp.broadcast_to(p["emb_novel"], emb.shape)
    node_bias = jnp.where((idx >= N_TOTAL_NODES)[:, None], novel, emb)
    joined = jnp.concatenate([x, node_bias, ann_input, nodetype_input], -1)
    h = jnp.maximum(joined @ p["w1"] + p["b1"], 0.0)
    h = jnp.maximum(h @ p["w2"] + p["b2"], 0.0)
    o = h @ p["wo"] + p["bo"]
    return jax.nn.sigmoid(o)


if __name__ == "__main__":
    key = jax.random.PRNGKey(0)
    kp, kx, kn, ka, kt = jax.random.split(key, 5)

    N = 8  # number of nodes in the batch
    params = init_params(kp)
    folded = fold_params(params)

    x = jax.random.normal(kx, (N, STATE_DIM), jnp.float32)
    # include one out-of-vocab index to exercise the "novel embedding" path
    node_input = jnp.concatenate([
        jax.random.randint(kn, (N - 1,), 0, N_TOTAL_NODES),
        jnp.array([N_TOTAL_NODES + 2]),
    ]).astype(jnp.int32)
    ann_input = jax.random.normal(ka, (N, ANNOTATION_DIM), jnp.float32)
    nodetype_input = jax.random.normal(kt, (N, NODETYPE_DIM), jnp.float32)

    out = importance_net_forward(folded, x, node_input, ann_input, nodetype_input)
    out = jax.block_until_ready(out)

    ref = reference_forward(params, x, node_input, ann_input, nodetype_input)
    assert out.shape == (N, 1)
    assert bool(jnp.all((out >= 0.0) & (out <= 1.0)))
    assert float(jnp.max(jnp.abs(out - ref))) < 3e-2  # bf16-operand tolerance
    print("KERNEL_OK")
</pallas_src>

<mosaic_0001>
module attributes {stable_mosaic.version = 11 : i64} {
  func.func @importance_kernel(%arg0: i32, %arg1: memref<128x1xi32, #tpu.memory_space<vmem>>, %arg2: memref<128x32xf32, #tpu.memory_space<vmem>>, %arg3: memref<128x2xf32, #tpu.memory_space<vmem>>, %arg4: memref<128x3xf32, #tpu.memory_space<vmem>>, %arg5: memref<96x32xbf16, #tpu.memory_space<vmem>>, %arg6: memref<16x32xf32, #tpu.memory_space<vmem>>, %arg7: memref<1x128xf32, #tpu.memory_space<vmem>>) attributes {dimension_semantics = [#tpu.dimension_semantics<parallel>], iteration_bounds = array<i64: 1>, scalar_prefetch = 0 : i64, scratch_operands = 0 : i64, tpu.core_type = #tpu.core_type<tc>, window_params = [{transform_indices = @transform_0, window_bounds = array<i64: 128, 1>}, {transform_indices = @transform_1, window_bounds = array<i64: 128, 32>}, {transform_indices = @transform_2, window_bounds = array<i64: 128, 2>}, {transform_indices = @transform_3, window_bounds = array<i64: 128, 3>}, {pipeline_mode = #tpu.pipeline_mode<synchronous>, transform_indices = @transform_4, window_bounds = array<i64: 96, 32>}, {pipeline_mode = #tpu.pipeline_mode<synchronous>, transform_indices = @transform_5, window_bounds = array<i64: 16, 32>}, {transform_indices = @transform_6, window_bounds = array<i64: 1, 128>}]} {
    %c0 = arith.constant 0 : index
    %c0_0 = arith.constant 0 : index
    %0 = vector.load %arg5[%c0, %c0_0] : memref<96x32xbf16, #tpu.memory_space<vmem>>, vector<64x32xbf16>
    %c64 = arith.constant 64 : index
    %c0_1 = arith.constant 0 : index
    %1 = vector.load %arg5[%c64, %c0_1] : memref<96x32xbf16, #tpu.memory_space<vmem>>, vector<32x32xbf16>
    %c0_2 = arith.constant 0 : index
    %c0_3 = arith.constant 0 : index
    %2 = vector.load %arg6[%c0_2, %c0_3] : memref<16x32xf32, #tpu.memory_space<vmem>>, vector<1x32xf32>
    %c1 = arith.constant 1 : index
    %c0_4 = arith.constant 0 : index
    %3 = vector.load %arg6[%c1, %c0_4] : memref<16x32xf32, #tpu.memory_space<vmem>>, vector<1x32xf32>
    %c2 = arith.constant 2 : index
    %c0_5 = arith.constant 0 : index
    %4 = vector.load %arg6[%c2, %c0_5] : memref<16x32xf32, #tpu.memory_space<vmem>>, vector<1x1xf32>
    %c8 = arith.constant 8 : index
    %c0_6 = arith.constant 0 : index
    %5 = vector.load %arg6[%c8, %c0_6] : memref<16x32xf32, #tpu.memory_space<vmem>>, vector<8x32xf32>
    %c0_7 = arith.constant 0 : index
    %c0_8 = arith.constant 0 : index
    %6 = vector.load %arg1[%c0_7, %c0_8] : memref<128x1xi32, #tpu.memory_space<vmem>>, vector<128x1xi32>
    %c0_i32 = arith.constant 0 : i32
    %c16_i32 = arith.constant 16 : i32
    %7 = vector.broadcast %c0_i32 : i32 to vector<128x1xi32>
    %8 = arith.maxsi %7, %6 : vector<128x1xi32>
    %9 = vector.broadcast %c16_i32 : i32 to vector<128x1xi32>
    %10 = arith.minsi %9, %8 : vector<128x1xi32>
    %11 = tpu.iota {dimensions = array<i32: 1>} : vector<128x17xi32>
    %12 = vector.broadcast %10 : vector<128x1xi32> to vector<128x17xi32>
    %13 = arith.cmpi eq, %11, %12 : vector<128x17xi32>
    %14 = arith.extui %13 : vector<128x17xi1> to vector<128x17xi32>
    %15 = arith.sitofp %14 : vector<128x17xi32> to vector<128x17xf32>
    %c0_9 = arith.constant 0 : index
    %c0_10 = arith.constant 0 : index
    %16 = vector.load %arg2[%c0_9, %c0_10] : memref<128x32xf32, #tpu.memory_space<vmem>>, vector<128x32xf32>
    %c0_11 = arith.constant 0 : index
    %c0_12 = arith.constant 0 : index
    %17 = vector.load %arg3[%c0_11, %c0_12] : memref<128x2xf32, #tpu.memory_space<vmem>>, vector<128x2xf32>
    %c0_13 = arith.constant 0 : index
    %c0_14 = arith.constant 0 : index
    %18 = vector.load %arg4[%c0_13, %c0_14] : memref<128x3xf32, #tpu.memory_space<vmem>>, vector<128x3xf32>
    %cst = arith.constant 0.000000e+00 : f32
    %19 = vector.broadcast %cst : f32 to vector<128x10xf32>
    %20 = tpu.concatenate %16, %15, %17, %18, %19 in 1 : vector<128x32xf32>, vector<128x17xf32>, vector<128x2xf32>, vector<128x3xf32>, vector<128x10xf32> -> vector<128x64xf32>
    %21 = arith.truncf %20 : vector<128x64xf32> to vector<128x64xbf16>
    %cst_15 = arith.constant dense<0.000000e+00> : vector<128x32xf32>
    %22 = tpu.matmul %21, %0, %cst_15 {dimension_numbers = #tpu.dot_dimension_numbers<[1], [0], [0], [1], [0, 0, 1, 1], [], []>} : vector<128x64xbf16>, vector<64x32xbf16>, vector<128x32xf32> -> vector<128x32xf32>
    %23 = vector.broadcast %2 : vector<1x32xf32> to vector<128x32xf32>
    %24 = arith.addf %22, %23 : vector<128x32xf32>
    %cst_16 = arith.constant 0.000000e+00 : f32
    %25 = vector.broadcast %cst_16 : f32 to vector<128x32xf32>
    %26 = arith.maximumf %24, %25 : vector<128x32xf32>
    %27 = arith.truncf %26 : vector<128x32xf32> to vector<128x32xbf16>
    %cst_17 = arith.constant dense<0.000000e+00> : vector<128x32xf32>
    %28 = tpu.matmul %27, %1, %cst_17 {dimension_numbers = #tpu.dot_dimension_numbers<[1], [0], [0], [1], [0, 0, 1, 1], [], []>} : vector<128x32xbf16>, vector<32x32xbf16>, vector<128x32xf32> -> vector<128x32xf32>
    %29 = vector.broadcast %3 : vector<1x32xf32> to vector<128x32xf32>
    %30 = arith.addf %28, %29 : vector<128x32xf32>
    %cst_18 = arith.constant 0.000000e+00 : f32
    %31 = vector.broadcast %cst_18 : f32 to vector<128x32xf32>
    %32 = arith.maximumf %30, %31 : vector<128x32xf32>
    "tpu.trace_start"() <{level = 10 : i32, message = "oh,nh->on"}> : () -> ()
    %cst_19 = arith.constant dense<0.000000e+00> : vector<8x128xf32>
    %33 = tpu.matmul %5, %32, %cst_19 {dimension_numbers = #tpu.dot_dimension_numbers<[1], [1], [0], [0], [0, 0, 1, 0], [], []>} : vector<8x32xf32>, vector<128x32xf32>, vector<8x128xf32> -> vector<8x128xf32>
    "tpu.trace_stop"() : () -> ()
    %34 = vector.extract_strided_slice %33 {offsets = [0, 0], sizes = [1, 128], strides = [1, 1]} : vector<8x128xf32> to vector<1x128xf32>
    %35 = vector.broadcast %4 : vector<1x1xf32> to vector<1x128xf32>
    %36 = arith.addf %34, %35 : vector<1x128xf32>
    %cst_20 = arith.constant 5.000000e-01 : f32
    %37 = vector.broadcast %cst_20 : f32 to vector<1x128xf32>
    %38 = arith.mulf %37, %36 : vector<1x128xf32>
    %39 = math.tanh %38 : vector<1x128xf32>
    %cst_21 = arith.constant 1.000000e+00 : f32
    %40 = vector.broadcast %cst_21 : f32 to vector<1x128xf32>
    %41 = arith.addf %39, %40 : vector<1x128xf32>
    %cst_22 = arith.constant 5.000000e-01 : f32
    %42 = vector.broadcast %cst_22 : f32 to vector<1x128xf32>
    %43 = arith.mulf %42, %41 : vector<1x128xf32>
    %c0_23 = arith.constant 0 : index
    %c0_24 = arith.constant 0 : index
    %44 = vector.load %arg7[%c0_23, %c0_24] : memref<1x128xf32, #tpu.memory_space<vmem>>, vector<1x128xf32>
    tpu.vector_store %arg7[%c0_23, %c0_24], %43 {strides = array<i32>} : memref<1x128xf32, #tpu.memory_space<vmem>>, vector<1x128xf32>,
    return
  }
  func.func @transform_0(%arg0: i32) -> (i32, i32) {
    %c0_i32 = arith.constant 0 : i32
    %c0_i32_0 = arith.constant 0 : i32
    return %arg0, %c0_i32 : i32, i32
  }
  func.func @transform_1(%arg0: i32) -> (i32, i32) {
    %c0_i32 = arith.constant 0 : i32
    %c0_i32_0 = arith.constant 0 : i32
    return %arg0, %c0_i32 : i32, i32
  }
  func.func @transform_2(%arg0: i32) -> (i32, i32) {
    %c0_i32 = arith.constant 0 : i32
    %c0_i32_0 = arith.constant 0 : i32
    return %arg0, %c0_i32 : i32, i32
  }
  func.func @transform_3(%arg0: i32) -> (i32, i32) {
    %c0_i32 = arith.constant 0 : i32
    %c0_i32_0 = arith.constant 0 : i32
    return %arg0, %c0_i32 : i32, i32
  }
  func.func @transform_4(%arg0: i32) -> (i32, i32) {
    %c0_i32 = arith.constant 0 : i32
    %c0_i32_0 = arith.constant 0 : i32
    %c0_i32_1 = arith.constant 0 : i32
    return %c0_i32, %c0_i32_0 : i32, i32
  }
  func.func @transform_5(%arg0: i32) -> (i32, i32) {
    %c0_i32 = arith.constant 0 : i32
    %c0_i32_0 = arith.constant 0 : i32
    %c0_i32_1 = arith.constant 0 : i32
    return %c0_i32, %c0_i32_0 : i32, i32
  }
  func.func @transform_6(%arg0: i32) -> (i32, i32) {
    %c0_i32 = arith.constant 0 : i32
    %c0_i32_0 = arith.constant 0 : i32
    return %c0_i32, %arg0 : i32, i32
  }
}

</mosaic_0001>

<bundles_post_ra>
// kernel: tpu_custom_call.1
= control target key start
LH: loop header
LB: loop body
LE: loop exit
PB: predicated region body
PF: predicated region fallthrough
CT: control target
= control target key end

     0   :  { %v1342_v3 = vmov 0   ;;  %s1814_s0 = inlined_call_operand.vmem [shape: s32[128,1], index: 0, kind: input, shape index: {}]   ;;  %s1815_s1 = inlined_call_operand.vmem [shape: f32[128,32], index: 1, kind: input, shape index: {}]   ;;  %s1816_s2 = inlined_call_operand.vmem [shape: f32[128,2], index: 2, kind: input, shape index: {}]   ;;  %s1817_s3 = inlined_call_operand.vmem [shape: f32[128,3], index: 3, kind: input, shape index: {}]   ;;  %s1818_s4 = inlined_call_operand.vmem [shape: bf16[96,32], index: 4, kind: input, shape index: {}]   ;;  %s1819_s5 = inlined_call_operand.vmem [shape: f32[16,32], index: 5, kind: input, shape index: {}]   ;;  %s1820_s6 = inlined_call_operand.hbm [shape: f32[1,128], index: 6, kind: output, shape index: {}]  }
   0x1   :  { %v43_v0 = vld [vmem:[%s1814_s0 + $0x10] sm:$0xff]  ;;  %v41_v1 = vld [vmem:[%s1814_s0] sm:$0xff]  ;;  %v44_v2 = vld [vmem:[%s1814_s0 + $0x18] sm:$0xff]  ;;  %1191 = vset.pattern.permute.xlu1 %v1342_v3  ;;  %1190 = vset.pattern.permute.xlu0 %v1342_v3 }
   0x2   :  { %vm61_vm0 = vcmp.gt.s32.totalorder %v43_v0, 0  ;;  %vm57_vm1 = vcmp.gt.s32.totalorder %v41_v1, 0  ;;  %vm63_vm2 = vcmp.gt.s32.totalorder %v44_v2, 0  ;;  %v42_v4 = vld [vmem:[%s1814_s0 + $0x8] sm:$0xff]  ;;  %v45_v9 = vld [vmem:[%s1814_s0 + $0x20] sm:$0xff]  ;;  %v48_v10 = vld [vmem:[%s1814_s0 + $0x38] sm:$0xff] }
   0x3   :  { %v46_v5 = vld [vmem:[%s1814_s0 + $0x28] sm:$0xff]  ;;  %v62_v6 = vsel %vm61_vm0, %v43_v0, 0  ;;  %v58_v7 = vsel %vm57_vm1, %v41_v1, 0  ;;  %v64_v8 = vsel %vm63_vm2, %v44_v2, 0  ;;  %vm59_vm3 = vcmp.gt.s32.totalorder %v42_v4, 0  ;;  %v47_v12 = vld [vmem:[%s1814_s0 + $0x30] sm:$0xff] }
   0x4   :  { %vm93_vm4 = vcmp.lt.s32.totalorder %v62_v6, 16  ;;  %vm89_vm5 = vcmp.lt.s32.totalorder %v58_v7, 16  ;;  %vm95_vm6 = vcmp.lt.s32.totalorder %v64_v8, 16  ;;  %v60_v11 = vsel %vm59_vm3, %v42_v4, 0  ;;  %v50_v16 = vld [vmem:[%s1814_s0 + $0x48] sm:$0xff]  ;;  %v49_v20 = vld [vmem:[%s1814_s0 + $0x40] sm:$0xff] }
   0x5   :  { %v94_v13 = vsel %vm93_vm4, %v62_v6, 16  ;;  %v90_v14 = vsel %vm89_vm5, %v58_v7, 16  ;;  %vm91_vm7 = vcmp.lt.s32.totalorder %v60_v11, 16  ;;  %v96_v15 = vsel %vm95_vm6, %v64_v8, 16  ;;  %v52_v21 = vld [vmem:[%s1814_s0 + $0x58] sm:$0xff]  ;;  %v51_v22 = vld [vmem:[%s1814_s0 + $0x50] sm:$0xff] }
   0x6   :  { %130 = vperm.xlu1 %1191, %v94_v13   ;;  %124 = vperm.xlu0 %1190, %v90_v14   ;;  %vm67_vm8 = vcmp.gt.s32.totalorder %v46_v5, 0  ;;  %vm65_vm9 = vcmp.gt.s32.totalorder %v45_v9, 0  ;;  %vm71_vm10 = vcmp.gt.s32.totalorder %v48_v10, 0  ;;  %v92_v17 = vsel %vm91_vm7, %v60_v11, 16  ;;  %v54_v31 = vld [vmem:[%s1814_s0 + $0x68] sm:$0xff]  ;;  %v53_v32 = vld [vmem:[%s1814_s0 + $0x60] sm:$0xff] }
   0x7   :  { %v68_v18 = vsel %vm67_vm8, %v46_v5, 0  ;;  %v66_v19 = vsel %vm65_vm9, %v45_v9, 0  ;;  %vm69_vm11 = vcmp.gt.s32.totalorder %v47_v12, 0  ;;  %v72_v23 = vsel %vm71_vm10, %v48_v10, 0  ;;  %v56_v35 = vld [vmem:[%s1814_s0 + $0x78] sm:$0xff]  ;;  %v55_v36 = vld [vmem:[%s1814_s0 + $0x70] sm:$0xff] }
   0x8   :  { %vm99_vm12 = vcmp.lt.s32.totalorder %v68_v18, 16  ;;  %vm97_vm13 = vcmp.lt.s32.totalorder %v66_v19, 16  ;;  %v70_v24 = vsel %vm69_vm11, %v47_v12, 0  ;;  %vm75_vm14 = vcmp.gt.s32.totalorder %v50_v16, 0 }
   0x9   :  { %vm73_vm15 = vcmp.gt.s32.totalorder %v49_v20, 0  ;;  %vm79_vm0 = vcmp.gt.s32.totalorder %v52_v21, 0  ;;  %v100_v25 = vsel %vm99_vm12, %v68_v18, 16  ;;  %v98_v26 = vsel %vm97_vm13, %v66_v19, 16 }
   0xa   :  { %133 = vperm.xlu1 %1191, %v96_v15   ;;  %127 = vperm.xlu0 %1190, %v92_v17   ;;  %vm77_vm1 = vcmp.gt.s32.totalorder %v51_v22, 0  ;;  %vm103_vm2 = vcmp.lt.s32.totalorder %v72_v23, 16  ;;  %vm101_vm3 = vcmp.lt.s32.totalorder %v70_v24, 16  ;;  %v76_v27 = vsel %vm75_vm14, %v50_v16, 0 }
   0xb   :  { %v74_v28 = vsel %vm73_vm15, %v49_v20, 0  ;;  %v80_v29 = vsel %vm79_vm0, %v52_v21, 0  ;;  %v78_v30 = vsel %vm77_vm1, %v51_v22, 0  ;;  %v104_v33 = vsel %vm103_vm2, %v72_v23, 16 }
   0xc   :  { %v102_v34 = vsel %vm101_vm3, %v70_v24, 16  ;;  %vm107_vm4 = vcmp.lt.s32.totalorder %v76_v27, 16  ;;  %vm105_vm5 = vcmp.lt.s32.totalorder %v74_v28, 16  ;;  %vm111_vm6 = vcmp.lt.s32.totalorder %v80_v29, 16 }
   0xd   :  { %vm109_vm7 = vcmp.lt.s32.totalorder %v78_v30, 16  ;;  %vm83_vm8 = vcmp.gt.s32.totalorder %v54_v31, 0  ;;  %vm81_vm9 = vcmp.gt.s32.totalorder %v53_v32, 0  ;;  %v108_v37 = vsel %vm107_vm4, %v76_v27, 16 }
   0xe   :  { %139 = vperm.xlu1 %1191, %v100_v25   ;;  %136 = vperm.xlu0 %1190, %v98_v26   ;;  %v106_v38 = vsel %vm105_vm5, %v74_v28, 16  ;;  %v112_v39 = vsel %vm111_vm6, %v80_v29, 16  ;;  %v110_v40 = vsel %vm109_vm7, %v78_v30, 16  ;;  %v84_v41 = vsel %vm83_vm8, %v54_v31, 0 }
   0xf   :  { %vm87_vm10 = vcmp.gt.s32.totalorder %v56_v35, 0  ;;  %v82_v42 = vsel %vm81_vm9, %v53_v32, 0  ;;  %vm85_vm11 = vcmp.gt.s32.totalorder %v55_v36, 0 }
  0x12   :  { %145 = vperm.xlu1 %1191, %v104_v33   ;;  %142 = vperm.xlu0 %1190, %v102_v34  }
  0x16   :  { %151 = vperm.xlu1 %1191, %v108_v37   ;;  %148 = vperm.xlu0 %1190, %v106_v38  }
  0x17   :  { %11 = vsyncpa [#allocation3], 0  ;;  %vm115_vm12 = vcmp.lt.s32.totalorder %v84_v41, 16  ;;  %vm113_vm13 = vcmp.lt.s32.totalorder %v82_v42, 16  ;;  %v88_v43 = vsel %vm87_vm10, %v56_v35, 0  ;;  %v86_v44 = vsel %vm85_vm11, %v55_v36, 0 }
  0x18   :  { %v116_v45 = vsel %vm115_vm12, %v84_v41, 16  ;;  %v114_v46 = vsel %vm113_vm13, %v82_v42, 16  ;;  %vm119_vm14 = vcmp.lt.s32.totalorder %v88_v43, 16  ;;  %vm117_vm15 = vcmp.lt.s32.totalorder %v86_v44, 16  ;;  %v237_v47 = vld [vmem:[%s1816_s2 + $0x10] sm:$0xff]  ;;  %v238_v50 = vld [vmem:[%s1816_s2 + $0x18] sm:$0xff] }
  0x19   :  { %v120_v48 = vsel %vm119_vm14, %v88_v43, 16  ;;  %v118_v49 = vsel %vm117_vm15, %v86_v44, 16  ;;  %v235_v51 = vld [vmem:[%s1816_s2] sm:$0xff]  ;;  %v236_v52 = vld [vmem:[%s1816_s2 + $0x8] sm:$0xff]  ;;  %v1197_v53 = vpack.i.bf16 %v238_v50, %v237_v47  ;;  %v253_v55 = vld [vmem:[%s1817_s3 + $0x10] sm:$0xff]  ;;  %s1343_s20 = smov 49   ;;  %v121_v11 = vlaneseq }
  0x1a   :  { %157 = vperm.xlu1 %1191, %v112_v39   ;;  %154 = vperm.xlu0 %1190, %v110_v40   ;;  %v1192_v54 = vpack.i.bf16 %v236_v52, %v235_v51  ;;  %v254_v56 = vld [vmem:[%s1817_s3 + $0x18] sm:$0xff]  ;;  %v251_v57 = vld [vmem:[%s1817_s3] sm:$0xff]  ;;  %v252_v58 = vld [vmem:[%s1817_s3 + $0x8] sm:$0xff]  ;;  %s1344_s0 = smov 51   ;;  %v1345_v21 = vmov 0.0   ;;  %s1346_s30 = smov 32  }
  0x1b   :  { %v1207_v59 = vpack.i.bf16 %v254_v56, %v253_v55  ;;  %v1202_v60 = vpack.i.bf16 %v252_v58, %v251_v57  ;;  %v241_v61 = vld [vmem:[%s1816_s2 + $0x30] sm:$0xff]  ;;  %v242_v62 = vld [vmem:[%s1816_s2 + $0x38] sm:$0xff]  ;;  %v239_v63 = vld [vmem:[%s1816_s2 + $0x20] sm:$0xff]  ;;  %v1497_v13 = vand.u32 127, %v121_v11  ;;  %s1348_s19 = smov [#allocation2]  }
  0x1c   :  { %v240_v0 = vld [vmem:[%s1816_s2 + $0x28] sm:$0xff]  ;;  %v1217_v1 = vpack.i.bf16 %v242_v62, %v241_v61  ;;  %v257_v3 = vld [vmem:[%s1817_s3 + $0x30] sm:$0xff]  ;;  %v1312_v4 = vld [vmem:[%s1818_s4 + $0x18] sm:$0xff]   ;;  %s1000_s21 = sshll.u32 %s1348_s19, 4  ;;  %s1001_s21 = int_to_ptr.vmem [resolvable:$true] %s1000_s21 }
  0x1d   :  { %v1212_v2 = vpack.i.bf16 %v240_v0, %v239_v63  ;;  %v258_v5 = vld [vmem:[%s1817_s3 + $0x38] sm:$0xff]  ;;  %v255_v6 = vld [vmem:[%s1817_s3 + $0x20] sm:$0xff]  ;;  %v256_v7 = vld [vmem:[%s1817_s3 + $0x28] sm:$0xff]  ;;  %1104 = vmatprep.subr.bf16.mxu0 %v1312_v4  ;;  %s1320_s22 = scalar_lea.vmem %s1001_s21, 16  ;;  %s1324_s23 = scalar_lea.vmem %s1001_s21, 32 }
  0x1e   :  { %163 = vperm.xlu1 %1191, %v116_v45   ;;  %160 = vperm.xlu0 %1190, %v114_v46   ;;  %v1227_v8 = vpack.i.bf16 %v258_v5, %v257_v3  ;;  %v1222_v9 = vpack.i.bf16 %v256_v7, %v255_v6  ;;  %v1313_v10 = vld [vmem:[%s1818_s4 + $0x10] sm:$0xff]   ;;  %v1314_v12 = vld [vmem:[%s1818_s4 + $0x8] sm:$0xff]   ;;  %v1315_v14 = vld [vmem:[%s1818_s4] sm:$0xff]   ;;  %p1321_p0 = scmp.ne.s32.totalorder %s1001_s21, %s1320_s22  ;;  %p1325_p1 = scmp.lt.s32.totalorder %s1001_s21, %s1001_s21 }
  0x1f   :  { %1105 = vmatpush3.bf16.msra.mxu0 %v1312_v4  ;;  %v245_v19 = vld [vmem:[%s1816_s2 + $0x50] sm:$0xff]  ;;  %v246_v20 = vld [vmem:[%s1816_s2 + $0x58] sm:$0xff]  ;;  %v243_v26 = vld [vmem:[%s1816_s2 + $0x40] sm:$0xff]  ;;  %p1326_p2 = scmp.lt.s32.totalorder %s1324_s23, %s1320_s22 }
  0x20   :  { %1106 = vmatprep.subr.bf16.mxu0 %v1313_v10  ;;  %v244_v27 = vld [vmem:[%s1816_s2 + $0x48] sm:$0xff]  ;;  %v1247_v32 = vpack.i.bf16 %v246_v20, %v245_v19  ;;  %v259_v38 = vld [vmem:[%s1817_s3 + $0x40] sm:$0xff]  ;;  %v261_v42 = vld [vmem:[%s1817_s3 + $0x50] sm:$0xff] }
  0x21   :  { %v1237_v33 = vpack.i.bf16 %v244_v27, %v243_v26  ;;  %v260_v39 = vld [vmem:[%s1817_s3 + $0x48] sm:$0xff]  ;;  %v262_v43 = vld [vmem:[%s1817_s3 + $0x58] sm:$0xff]  ;;  %v249_v58 = vld [vmem:[%s1816_s2 + $0x70] sm:$0xff]  ;;  %p1327_p3 = por %p1326_p2, %p1325_p1 }
  0x22   :  { %169 = vperm.xlu1 %1191, %v120_v48   ;;  %166 = vperm.xlu0 %1190, %v118_v49   ;;  %v1257_v48 = vpack.i.bf16 %v260_v39, %v259_v38  ;;  %v1267_v49 = vpack.i.bf16 %v262_v43, %v261_v42  ;;  %v248_v55 = vld [vmem:[%s1816_s2 + $0x68] sm:$0xff]  ;;  %v263_v6 = vld [vmem:[%s1817_s3 + $0x60] sm:$0xff]  ;;  %v266_v11 = vld [vmem:[%s1817_s3 + $0x78] sm:$0xff] }
  0x23   :  { %1107 = vmatpush3.bf16.msra.mxu0 %v1313_v10  ;;  %v265_v10 = vld [vmem:[%s1817_s3 + $0x70] sm:$0xff]  ;;  %p1328_p4 = pnand %p1327_p3, %p1321_p0 }
  0x24   :  { %1108 = vmatprep.subr.bf16.mxu0 %v1314_v12  ;;  %v221_v26 = vld [vmem:[%s1815_s1 + $0x10] sm:$0xff] }
  0x26   :  { %1198 = vrot.lane.b32.xlu1 %v1197_v53, %s1343_s20  ;;  %1193 = vrot.lane.b32.xlu0 %v1192_v54, %s1343_s20  ;;  %v247_v54 = vld [vmem:[%s1816_s2 + $0x60] sm:$0xff] }
  0x27   :  { %1109 = vmatpush3.bf16.msra.mxu0 %v1314_v12  ;;  %v1277_v0 = vpack.i.bf16 %v248_v55, %v247_v54 }
  0x28   :  { %1110 = vmatprep.subr.bf16.mxu0 %v1315_v14 }
  0x2a   :  { %1208 = vrot.lane.b32.xlu1 %v1207_v59, %s1344_s0  ;;  %1203 = vrot.lane.b32.xlu0 %v1202_v60, %s1344_s0  ;;  %v250_v59 = vld [vmem:[%s1816_s2 + $0x78] sm:$0xff] }
  0x2b   :  { %1111 = vmatpush3.bf16.msra.mxu0 %v1315_v14 }
  0x2e   :  { %1218 = vrot.lane.b32.xlu1 %v1217_v1, %s1343_s20  ;;  %1213 = vrot.lane.b32.xlu0 %v1212_v2, %s1343_s20  ;;  %v1287_v1 = vpack.i.bf16 %v250_v59, %v249_v58 }
  0x32   :  { %1228 = vrot.lane.b32.xlu1 %v1227_v8, %s1344_s0  ;;  %1223 = vrot.lane.b32.xlu0 %v1222_v9, %s1344_s0  ;;  %v264_v9 = vld [vmem:[%s1817_s3 + $0x68] sm:$0xff] }
  0x33   :  { %v1297_v14 = vpack.i.bf16 %v264_v9, %v263_v6  ;;  %v224_v6 = vld [vmem:[%s1815_s1 + $0x28] sm:$0xff] }
  0x81   :  { %v131_v15 = vpop.permute.xlu1 %130  ;;  %v125_v16 = vpop.permute.xlu0 %124 }
  0x82   :  { %vm173_vm0 = vcmp.eq.s32.totalorder %v1497_v13, %v131_v15  ;;  %vm171_vm1 = vcmp.eq.s32.totalorder %v1497_v13, %v125_v16  ;;  %v1307_v15 = vpack.i.bf16 %v266_v11, %v265_v10  ;;  %v39_v16 = vld [vmem:[%s1819_s5 + $0x2] sm:$0x1] }
  0x83   :  { %v1010_v22 = vsel %vm173_vm0, 1.0, %v1345_v21  ;;  %v1008_v23 = vsel %vm171_vm1, 1.0, %v1345_v21  ;;  %vm459_vm0 = vcmask 261120   ;;  %vm476_vm1 = vcmask 400384  }
  0x85   :  { %v134_v17 = vpop.permute.xlu1 %133  ;;  %v128_v18 = vpop.permute.xlu0 %127 }
  0x86   :  { %vm174_vm2 = vcmp.eq.s32.totalorder %v1497_v13, %v134_v17  ;;  %vm172_vm3 = vcmp.eq.s32.totalorder %v1497_v13, %v128_v18 }
  0x87   :  { %v1011_v24 = vsel %vm174_vm2, 1.0, %v1345_v21  ;;  %v1009_v25 = vsel %vm172_vm3, 1.0, %v1345_v21  ;;  %vm493_vm2 = vcmask 416768   ;;  %vm510_vm3 = vcmask 441344  }
  0x88   :  { %v1242_v28 = vpack.i.bf16 %v1011_v24, %v1010_v22  ;;  %v1232_v29 = vpack.i.bf16 %v1009_v25, %v1008_v23 }
  0x89   :  { %v140_v30 = vpop.permute.xlu1 %139  ;;  %v137_v31 = vpop.permute.xlu0 %136 }
  0x8a   :  { %vm176_vm4 = vcmp.eq.s32.totalorder %v1497_v13, %v140_v30  ;;  %vm175_vm5 = vcmp.eq.s32.totalorder %v1497_v13, %v137_v31  ;;  %1243 = vrot.lane.b32.xlu1 %v1242_v28, %s1346_s30  ;;  %1233 = vrot.lane.b32.xlu0 %v1232_v29, %s1346_s30  ;;  %v222_v31 = vld [vmem:[%s1815_s1 + $0x18] sm:$0xff] }
  0x8b   :  { %v1013_v34 = vsel %vm176_vm4, 1.0, %v1345_v21  ;;  %v1012_v35 = vsel %vm175_vm5, 1.0, %v1345_v21  ;;  %vm563_vm4 = vcmask 523264   ;;  %vm1347_vm5 = vmmov 0  }
  0x8c   :  { %v1252_v44 = vpack.i.bf16 %v1013_v34, %v1012_v35  ;;  %v220_v34 = vld [vmem:[%s1815_s1 + $0x8] sm:$0xff] }
  0x8d   :  { %v146_v36 = vpop.permute.xlu1 %145  ;;  %v143_v37 = vpop.permute.xlu0 %142 }
  0x8e   :  { %vm178_vm6 = vcmp.eq.s32.totalorder %v1497_v13, %v146_v36  ;;  %vm177_vm7 = vcmp.eq.s32.totalorder %v1497_v13, %v143_v37  ;;  %1248 = vrot.lane.b32.xlu1 %v1247_v32, %s1343_s20  ;;  %1238 = vrot.lane.b32.xlu0 %v1237_v33, %s1343_s20  ;;  %v219_v33 = vld [vmem:[%s1815_s1] sm:$0xff] }
  0x8f   :  { %v1015_v40 = vsel %vm178_vm6, 1.0, %v1345_v21  ;;  %v1014_v41 = vsel %vm177_vm7, 1.0, %v1345_v21 }
  0x90   :  { %v1262_v45 = vpack.i.bf16 %v1015_v40, %v1014_v41 }
  0x91   :  { %v152_v46 = vpop.permute.xlu1 %151  ;;  %v149_v47 = vpop.permute.xlu0 %148 }
  0x92   :  { %vm180_vm8 = vcmp.eq.s32.totalorder %v1497_v13, %v152_v46  ;;  %vm179_vm9 = vcmp.eq.s32.totalorder %v1497_v13, %v149_v47  ;;  %1253 = vrot.lane.b32.xlu0 %v1252_v44, %s1346_s30  ;;  %1263 = vrot.lane.b32.xlu1 %v1262_v45, %s1346_s30 }
  0x93   :  { %v1017_v50 = vsel %vm180_vm8, 1.0, %v1345_v21  ;;  %v1016_v51 = vsel %vm179_vm9, 1.0, %v1345_v21 }
  0x94   :  { %v1272_v60 = vpack.i.bf16 %v1017_v50, %v1016_v51 }
  0x95   :  { %v158_v52 = vpop.permute.xlu1 %157  ;;  %v155_v53 = vpop.permute.xlu0 %154 }
  0x96   :  { %vm182_vm10 = vcmp.eq.s32.totalorder %v1497_v13, %v158_v52  ;;  %vm181_vm11 = vcmp.eq.s32.totalorder %v1497_v13, %v155_v53  ;;  %1258 = vrot.lane.b32.xlu0 %v1257_v48, %s1344_s0  ;;  %1268 = vrot.lane.b32.xlu1 %v1267_v49, %s1344_s0 }
  0x97   :  { %v1019_v56 = vsel %vm182_vm10, 1.0, %v1345_v21  ;;  %v1018_v57 = vsel %vm181_vm11, 1.0, %v1345_v21 }
  0x98   :  { %v1282_v61 = vpack.i.bf16 %v1019_v56, %v1018_v57 }
  0x99   :  { %v164_v62 = vpop.permute.xlu1 %163  ;;  %v161_v63 = vpop.permute.xlu0 %160 }
  0x9a   :  { %vm184_vm12 = vcmp.eq.s32.totalorder %v1497_v13, %v164_v62  ;;  %vm183_vm13 = vcmp.eq.s32.totalorder %v1497_v13, %v161_v63  ;;  %1273 = vrot.lane.b32.xlu0 %v1272_v60, %s1346_s30  ;;  %1283 = vrot.lane.b32.xlu1 %v1282_v61, %s1346_s30  ;;  %v225_v60 = vld [vmem:[%s1815_s1 + $0x30] sm:$0xff] }
  0x9b   :  { %v1021_v2 = vsel %vm184_vm12, 1.0, %v1345_v21  ;;  %v1020_v3 = vsel %vm183_vm13, 1.0, %v1345_v21 }
  0x9c   :  { %v1292_v12 = vpack.i.bf16 %v1021_v2, %v1020_v3  ;;  %v226_v3 = vld [vmem:[%s1815_s1 + $0x38] sm:$0xff] }
  0x9d   :  { %v170_v4 = vpop.permute.xlu1 %169  ;;  %v167_v5 = vpop.permute.xlu0 %166 }
  0x9e   :  { %vm186_vm14 = vcmp.eq.s32.totalorder %v1497_v13, %v170_v4  ;;  %vm185_vm15 = vcmp.eq.s32.totalorder %v1497_v13, %v167_v5  ;;  %1278 = vrot.lane.b32.xlu0 %v1277_v0, %s1343_s20  ;;  %1288 = vrot.lane.b32.xlu1 %v1287_v1, %s1343_s20  ;;  %v223_v5 = vld [vmem:[%s1815_s1 + $0x20] sm:$0xff] }
  0x9f   :  { %v1023_v7 = vsel %vm186_vm14, 1.0, %v1345_v21  ;;  %v1022_v8 = vsel %vm185_vm15, 1.0, %v1345_v21 }
  0xa0   :  { %v1302_v13 = vpack.i.bf16 %v1023_v7, %v1022_v8 }
  0xa1   :  { %v1199_v17 = vpop.permute.xlu1 %1198  ;;  %v1194_v18 = vpop.permute.xlu0 %1193 }
  0xa2   :  { %1293 = vrot.lane.b32.xlu0 %v1292_v12, %s1346_s30  ;;  %1303 = vrot.lane.b32.xlu1 %v1302_v13, %s1346_s30  ;;  %v1201_v27 = vunpack.i.h.bf16 %v1199_v17  ;;  %v1200_v28 = vunpack.i.l.bf16 %v1199_v17  ;;  %v1196_v29 = vunpack.i.h.bf16 %v1194_v18  ;;  %v1195_v30 = vunpack.i.l.bf16 %v1194_v18 }
  0xa5   :  { %v1209_v19 = vpop.permute.xlu1 %1208  ;;  %v1204_v20 = vpop.permute.xlu0 %1203 }
  0xa6   :  { %1298 = vrot.lane.b32.xlu0 %v1297_v14, %s1344_s0  ;;  %1308 = vrot.lane.b32.xlu1 %v1307_v15, %s1344_s0  ;;  %v1211_v40 = vunpack.i.h.bf16 %v1209_v19  ;;  %v1210_v41 = vunpack.i.l.bf16 %v1209_v19  ;;  %v1206_v42 = vunpack.i.h.bf16 %v1204_v20  ;;  %v1205_v43 = vunpack.i.l.bf16 %v1204_v20 }
  0xa9   :  { %v1601_v22 = vpop.permute.xlu1 %1218  ;;  %v1603_v23 = vpop.permute.xlu0 %1213 }
  0xaa   :  { %985 = vperm.xlu0 %1190, %v39_v16   ;;  %v1221_v54 = vunpack.i.h.bf16 %v1601_v22  ;;  %v1220_v55 = vunpack.i.l.bf16 %v1601_v22  ;;  %v1216_v1 = vunpack.i.h.bf16 %v1603_v23  ;;  %v1215_v2 = vunpack.i.l.bf16 %v1603_v23 }
  0xad   :  { %v1605_v24 = vpop.permute.xlu1 %1228  ;;  %v1607_v25 = vpop.permute.xlu0 %1223 }
  0xae   :  { %v1231_v14 = vunpack.i.h.bf16 %v1605_v24  ;;  %v1230_v15 = vunpack.i.l.bf16 %v1605_v24  ;;  %v1226_v16 = vunpack.i.h.bf16 %v1607_v25  ;;  %v1225_v17 = vunpack.i.l.bf16 %v1607_v25 }
  0xfc   :  { %v1244_v32 = vpop.permute.xlu1 %1243  ;;  %v1234_v35 = vpop.permute.xlu0 %1233 }
  0xfd   :  { %v1246_v36 = vunpack.i.h.bf16 %v1244_v32  ;;  %v1245_v37 = vunpack.i.l.bf16 %v1244_v32  ;;  %v1236_v38 = vunpack.i.h.bf16 %v1234_v35  ;;  %v1235_v39 = vunpack.i.l.bf16 %v1234_v35  ;;  %v229_v35 = vld [vmem:[%s1815_s1 + $0x50] sm:$0xff] }
  0xff   :  { %v463_v44 = vsel %vm459_vm0, %v222_v31, %v1246_v36  ;;  %v462_v45 = vsel %vm459_vm0, %v221_v26, %v1245_v37  ;;  %v461_v46 = vsel %vm459_vm0, %v220_v34, %v1236_v38  ;;  %v460_v47 = vsel %vm459_vm0, %v219_v33, %v1235_v39 }
 0x100   :  { %v479_v48 = vsel %vm476_vm1, %v462_v45, %v1200_v28  ;;  %v480_v49 = vsel %vm476_vm1, %v463_v44, %v1201_v27  ;;  %v1627_v50 = vpop.permute.xlu1 %1248  ;;  %v1629_v51 = vpop.permute.xlu0 %1238  ;;  %v477_v52 = vsel %vm476_vm1, %v460_v47, %v1195_v30  ;;  %v478_v53 = vsel %vm476_vm1, %v461_v46, %v1196_v29  ;;  %v227_v44 = vld [vmem:[%s1815_s1 + $0x40] sm:$0xff]  ;;  %v228_v45 = vld [vmem:[%s1815_s1 + $0x48] sm:$0xff] }
 0x101   :  { %v494_v56 = vsel %vm493_vm2, %v477_v52, %v1205_v43  ;;  %v495_v57 = vsel %vm493_vm2, %v478_v53, %v1206_v42  ;;  %v496_v58 = vsel %vm493_vm2, %v479_v48, %v1210_v41  ;;  %v497_v59 = vsel %vm493_vm2, %v480_v49, %v1211_v40  ;;  %v230_v42 = vld [vmem:[%s1815_s1 + $0x58] sm:$0xff] }
 0x102   :  { %v511_v61 = vsel %vm510_vm3, %v494_v56, 0.0  ;;  %v512_v62 = vsel %vm510_vm3, %v495_v57, 0.0  ;;  %v513_v63 = vsel %vm510_vm3, %v496_v58, 0.0  ;;  %v514_v0 = vsel %vm510_vm3, %v497_v59, 0.0 }
 0x103   :  { %v527_v8 = vpack.c.bf16 %v512_v62, %v511_v61  ;;  %v528_v9 = vpack.c.bf16 %v514_v0, %v513_v63  ;;  %v1251_v29 = vunpack.i.h.bf16 %v1627_v50  ;;  %v1250_v30 = vunpack.i.l.bf16 %v1627_v50 }
 0x104   :  { %v1264_v4 = vpop.permute.xlu1 %1263  ;;  %v1254_v7 = vpop.permute.xlu0 %1253  ;;  %v1241_v40 = vunpack.i.h.bf16 %v1629_v51  ;;  %v1240_v41 = vunpack.i.l.bf16 %v1629_v51 }
 0x105   :  { %v1266_v10 = vunpack.i.h.bf16 %v1264_v4  ;;  %v1265_v11 = vunpack.i.l.bf16 %v1264_v4  ;;  %v1256_v12 = vunpack.i.h.bf16 %v1254_v7  ;;  %v1255_v13 = vunpack.i.l.bf16 %v1254_v7  ;;  %1112 = vmatprep.mubr.msk.bf16.mxu0 %vm563_vm4, %v527_v8  ;;  %v233_v7 = vld [vmem:[%s1815_s1 + $0x70] sm:$0xff] }
 0x106   :  { %1113 = vmatmul.mubr.msk.bf16.vlgmr.msra.gmra.mxu0 %vm563_vm4, %v528_v9 }
 0x107   :  { %v467_v18 = vsel %vm459_vm0, %v226_v3, %v1266_v10  ;;  %v466_v19 = vsel %vm459_vm0, %v225_v60, %v1265_v11  ;;  %v465_v20 = vsel %vm459_vm0, %v224_v6, %v1256_v12  ;;  %v464_v22 = vsel %vm459_vm0, %v223_v5, %v1255_v13  ;;  %v234_v12 = vld [vmem:[%s1815_s1 + $0x78] sm:$0xff] }
 0x108   :  { %v484_v23 = vsel %vm476_vm1, %v467_v18, %v1221_v54  ;;  %v483_v24 = vsel %vm476_vm1, %v466_v19, %v1220_v55  ;;  %v481_v26 = vsel %vm476_vm1, %v464_v22, %v1215_v2  ;;  %v482_v25 = vsel %vm476_vm1, %v465_v20, %v1216_v1  ;;  %v1269_v27 = vpop.permute.xlu1 %1268  ;;  %v1259_v28 = vpop.permute.xlu0 %1258 }
 0x109   :  { %v498_v31 = vsel %vm493_vm2, %v481_v26, %v1225_v17  ;;  %v499_v32 = vsel %vm493_vm2, %v482_v25, %v1226_v16  ;;  %v500_v33 = vsel %vm493_vm2, %v483_v24, %v1230_v15  ;;  %v501_v34 = vsel %vm493_vm2, %v484_v23, %v1231_v14  ;;  %v231_v14 = vld [vmem:[%s1815_s1 + $0x60] sm:$0xff]  ;;  %v232_v15 = vld [vmem:[%s1815_s1 + $0x68] sm:$0xff] }
 0x10a   :  { %v515_v36 = vsel %vm510_vm3, %v498_v31, 0.0  ;;  %v516_v37 = vsel %vm510_vm3, %v499_v32, 0.0  ;;  %v517_v38 = vsel %vm510_vm3, %v500_v33, 0.0  ;;  %v518_v39 = vsel %vm510_vm3, %v501_v34, 0.0 }
 0x10b   :  { %v529_v47 = vpack.c.bf16 %v516_v37, %v515_v36  ;;  %v530_v48 = vpack.c.bf16 %v518_v39, %v517_v38  ;;  %v1271_v53 = vunpack.i.h.bf16 %v1269_v27  ;;  %v1270_v54 = vunpack.i.l.bf16 %v1269_v27 }
 0x10c   :  { %v1284_v43 = vpop.permute.xlu1 %1283  ;;  %v1274_v46 = vpop.permute.xlu0 %1273  ;;  %v1261_v55 = vunpack.i.h.bf16 %v1259_v28  ;;  %v1260_v56 = vunpack.i.l.bf16 %v1259_v28 }
 0x10d   :  { %v1286_v49 = vunpack.i.h.bf16 %v1284_v43  ;;  %v1285_v50 = vunpack.i.l.bf16 %v1284_v43  ;;  %v1276_v52 = vunpack.i.h.bf16 %v1274_v46  ;;  %v1275_v51 = vunpack.i.l.bf16 %v1274_v46  ;;  %1116 = vmatprep.mubr.msk.bf16.mxu0 %vm563_vm4, %v529_v47 }
 0x10e   :  { %1117 = vmatmul.mubr.msk.bf16.gmra.mxu0 %vm563_vm4, %v530_v48 }
 0x10f   :  { %v471_v57 = vsel %vm459_vm0, %v230_v42, %v1286_v49  ;;  %v470_v58 = vsel %vm459_vm0, %v229_v35, %v1285_v50  ;;  %v469_v59 = vsel %vm459_vm0, %v228_v45, %v1276_v52  ;;  %v468_v60 = vsel %vm459_vm0, %v227_v44, %v1275_v51  ;;  %v1316_v51 = vld [vmem:[%s1818_s4 + $0x28] sm:$0xff]  }
 0x110   :  { %v488_v61 = vsel %vm476_vm1, %v471_v57, %v1251_v29  ;;  %v487_v62 = vsel %vm476_vm1, %v470_v58, %v1250_v30  ;;  %v485_v63 = vsel %vm476_vm1, %v468_v60, %v1240_v41  ;;  %v486_v0 = vsel %vm476_vm1, %v469_v59, %v1241_v40  ;;  %v1289_v1 = vpop.permute.xlu1 %1288  ;;  %v1279_v2 = vpop.permute.xlu0 %1278  ;;  %1128 = vmatprep.subr.bf16.mxu1 %v1316_v51 }
 0x111   :  { %v502_v3 = vsel %vm493_vm2, %v485_v63, %v1260_v56  ;;  %v503_v4 = vsel %vm493_vm2, %v486_v0, %v1261_v55  ;;  %v504_v5 = vsel %vm493_vm2, %v487_v62, %v1270_v54  ;;  %v505_v6 = vsel %vm493_vm2, %v488_v61, %v1271_v53  ;;  %1129 = vmatpush3.bf16.msra.mxu1 %v1316_v51  ;;  %v1317_v53 = vld [vmem:[%s1818_s4 + $0x20] sm:$0xff]  }
 0x112   :  { %v519_v8 = vsel %vm510_vm3, %v502_v3, 0.0  ;;  %v520_v9 = vsel %vm510_vm3, %v503_v4, 0.0  ;;  %v521_v10 = vsel %vm510_vm3, %v504_v5, 0.0  ;;  %v522_v11 = vsel %vm510_vm3, %v505_v6, 0.0  ;;  %1130 = vmatprep.subr.bf16.mxu1 %v1317_v53  ;;  %v1024_v56 = vld [vmem:[%s1819_s5] ss:$0 sm:$0xff] }
 0x113   :  { %v531_v17 = vpack.c.bf16 %v520_v9, %v519_v8  ;;  %v532_v18 = vpack.c.bf16 %v522_v11, %v521_v10  ;;  %v1291_v28 = vunpack.i.h.bf16 %v1289_v1  ;;  %v1290_v29 = vunpack.i.l.bf16 %v1289_v1 }
 0x114   :  { %v1304_v13 = vpop.permute.xlu1 %1303  ;;  %v1294_v16 = vpop.permute.xlu0 %1293  ;;  %v1281_v30 = vunpack.i.h.bf16 %v1279_v2  ;;  %v1280_v31 = vunpack.i.l.bf16 %v1279_v2 }
 0x115   :  { %v1306_v19 = vunpack.i.h.bf16 %v1304_v13  ;;  %v1305_v20 = vunpack.i.l.bf16 %v1304_v13  ;;  %v1296_v22 = vunpack.i.h.bf16 %v1294_v16  ;;  %v1295_v23 = vunpack.i.l.bf16 %v1294_v16  ;;  %1120 = vmatprep.mubr.msk.bf16.mxu0 %vm563_vm4, %v531_v17  ;;  %1131 = vmatpush3.bf16.msra.mxu1 %v1317_v53 }
 0x116   :  { %1121 = vmatmul.mubr.msk.bf16.gmra.mxu0 %vm563_vm4, %v532_v18  ;;  %1148 = vmatprep.subr.mxu1 %v1345_v21 }
 0x117   :  { %v475_v24 = vsel %vm459_vm0, %v234_v12, %v1306_v19  ;;  %v474_v26 = vsel %vm459_vm0, %v233_v7, %v1305_v20  ;;  %v473_v25 = vsel %vm459_vm0, %v232_v15, %v1296_v22  ;;  %v472_v27 = vsel %vm459_vm0, %v231_v14, %v1295_v23 }
 0x118   :  { %v1309_v32 = vpop.permute.xlu1 %1308  ;;  %v1299_v33 = vpop.permute.xlu0 %1298  ;;  %v491_v38 = vsel %vm476_vm1, %v474_v26, %v1290_v29  ;;  %v492_v39 = vsel %vm476_vm1, %v475_v24, %v1291_v28  ;;  %v489_v40 = vsel %vm476_vm1, %v472_v27, %v1280_v31  ;;  %v490_v41 = vsel %vm476_vm1, %v473_v25, %v1281_v30 }
 0x119   :  { %v1311_v34 = vunpack.i.h.bf16 %v1309_v32  ;;  %v1310_v35 = vunpack.i.l.bf16 %v1309_v32  ;;  %v1301_v36 = vunpack.i.h.bf16 %v1299_v33  ;;  %v1300_v37 = vunpack.i.l.bf16 %v1299_v33 }
 0x11b   :  { %v508_v42 = vsel %vm493_vm2, %v491_v38, %v1310_v35  ;;  %v509_v43 = vsel %vm493_vm2, %v492_v39, %v1311_v34  ;;  %v506_v44 = vsel %vm493_vm2, %v489_v40, %v1300_v37  ;;  %v507_v45 = vsel %vm493_vm2, %v490_v41, %v1301_v36 }
 0x11c   :  { %v525_v46 = vsel %vm510_vm3, %v508_v42, 0.0  ;;  %v526_v47 = vsel %vm510_vm3, %v509_v43, 0.0  ;;  %v523_v48 = vsel %vm510_vm3, %v506_v44, 0.0  ;;  %v524_v49 = vsel %vm510_vm3, %v507_v45, 0.0 }
 0x11d   :  { %v534_v50 = vpack.c.bf16 %v526_v47, %v525_v46  ;;  %v533_v52 = vpack.c.bf16 %v524_v49, %v523_v48 }
 0x11f   :  { %1124 = vmatprep.mubr.msk.bf16.mxu0 %vm563_vm4, %v533_v52 }
 0x120   :  { %1125 = vmatmul.mubr.msk.bf16.gmra.mxu0 %vm563_vm4, %v534_v50 }
 0x1c6   :  { %v1114_v54 = vpop.f32.mrf.mxu0 }
 0x1c7   :  { %v631_v60 = vadd.f32 %v1114_v54, %v1024_v56 }
 0x1c8   :  { %v622_v55 = vpop.f32.mrf.mxu0 }
 0x1c9   :  { %v623_v58 = vadd.f32 %v1024_v56, %v622_v55  ;;  %v687_v3 = vmax.f32 %v631_v60, 0.0 }
 0x1ca   :  { %v1115_v57 = vpop.f32.mrf.mxu0 }
 0x1cb   :  { %v634_v59 = vadd.f32 %v1115_v57, %v1024_v56  ;;  %v685_v1 = vmax.f32 %v623_v58, 0.0 }
 0x1cc   :  { %v625_v61 = vpop.f32.mrf.mxu0 }
 0x1cd   :  { %v626_v62 = vadd.f32 %v1024_v56, %v625_v61  ;;  %v688_v63 = vmax.f32 %v634_v59, 0.0 }
 0x1ce   :  { %v1118_v0 = vpop.f32.mrf.mxu0 }
 0x1cf   :  { %v686_v2 = vmax.f32 %v626_v62, 0.0  ;;  %v702_v6 = vpack.c.bf16 %v688_v63, %v687_v3  ;;  %v647_v10 = vadd.f32 %v1118_v0, %v1024_v56  ;;  %v1037_v62 = vld [vmem:[%s1819_s5 + $0x1] ss:$0 sm:$0xff] }
 0x1d0   :  { %v638_v4 = vpop.f32.mrf.mxu0 }
 0x1d1   :  { %v701_v5 = vpack.c.bf16 %v686_v2, %v685_v1  ;;  %v639_v8 = vadd.f32 %v1024_v56, %v638_v4  ;;  %v691_v17 = vmax.f32 %v647_v10, 0.0 }
 0x1d2   :  { %v1119_v7 = vpop.f32.mrf.mxu0 }
 0x1d3   :  { %v650_v9 = vadd.f32 %v1119_v7, %v1024_v56  ;;  %1132 = vmatprep.mubr.msk.bf16.mxu1 %vm459_vm0, %v701_v5  ;;  %v689_v15 = vmax.f32 %v639_v8, 0.0 }
 0x1d4   :  { %v641_v11 = vpop.f32.mrf.mxu0  ;;  %1133 = vmatmul.mubr.msk.bf16.vlgmr.msra.gmra.mxu1 %vm459_vm0, %v702_v6 }
 0x1d5   :  { %v642_v12 = vadd.f32 %v1024_v56, %v641_v11  ;;  %v692_v13 = vmax.f32 %v650_v9, 0.0 }
 0x1d6   :  { %v1122_v14 = vpop.f32.mrf.mxu0 }
 0x1d7   :  { %v690_v16 = vmax.f32 %v642_v12, 0.0  ;;  %v704_v20 = vpack.c.bf16 %v692_v13, %v691_v17  ;;  %v663_v26 = vadd.f32 %v1122_v14, %v1024_v56 }
 0x1d8   :  { %v654_v18 = vpop.f32.mrf.mxu0 }
 0x1d9   :  { %v703_v19 = vpack.c.bf16 %v690_v16, %v689_v15  ;;  %v655_v23 = vadd.f32 %v1024_v56, %v654_v18  ;;  %v695_v32 = vmax.f32 %v663_v26, 0.0 }
 0x1da   :  { %v1123_v22 = vpop.f32.mrf.mxu0 }
 0x1db   :  { %v666_v24 = vadd.f32 %v1123_v22, %v1024_v56  ;;  %1136 = vmatprep.mubr.msk.bf16.mxu1 %vm459_vm0, %v703_v19  ;;  %v693_v29 = vmax.f32 %v655_v23, 0.0 }
 0x1dc   :  { %v657_v25 = vpop.f32.mrf.mxu0  ;;  %1137 = vmatmul.mubr.msk.bf16.gmra.mxu1 %vm459_vm0, %v704_v20 }
 0x1dd   :  { %v658_v27 = vadd.f32 %v1024_v56, %v657_v25  ;;  %v696_v28 = vmax.f32 %v666_v24, 0.0 }
 0x1df   :  { %v694_v30 = vmax.f32 %v658_v27, 0.0  ;;  %v706_v35 = vpack.c.bf16 %v696_v28, %v695_v32 }
 0x1e0   :  { %v1126_v31 = vpop.f32.mrf.mxu0 }
 0x1e1   :  { %v705_v33 = vpack.c.bf16 %v694_v30, %v693_v29  ;;  %v679_v39 = vadd.f32 %v1126_v31, %v1024_v56 }
 0x1e2   :  { %v670_v34 = vpop.f32.mrf.mxu0 }
 0x1e3   :  { %1140 = vmatprep.mubr.msk.bf16.mxu1 %vm459_vm0, %v705_v33  ;;  %v671_v37 = vadd.f32 %v1024_v56, %v670_v34  ;;  %v699_v45 = vmax.f32 %v679_v39, 0.0  ;;  %v40_v34 = vld [vmem:[%s1819_s5 + $0x8] sm:$0xff] }
 0x1e4   :  { %v1127_v36 = vpop.f32.mrf.mxu0  ;;  %1141 = vmatmul.mubr.msk.bf16.gmra.mxu1 %vm459_vm0, %v706_v35  ;;  %v986_v35 = vpop.permute.xlu0 %985 }
 0x1e5   :  { %v682_v38 = vadd.f32 %v1127_v36, %v1024_v56  ;;  %v697_v43 = vmax.f32 %v671_v37, 0.0 }
 0x1e6   :  { %v673_v40 = vpop.f32.mrf.mxu0 }
 0x1e7   :  { %v674_v41 = vadd.f32 %v1024_v56, %v673_v40  ;;  %v700_v42 = vmax.f32 %v682_v38, 0.0 }
 0x1e9   :  { %v698_v44 = vmax.f32 %v674_v41, 0.0  ;;  %v708_v47 = vpack.c.bf16 %v700_v42, %v699_v45 }
 0x1eb   :  { %v707_v46 = vpack.c.bf16 %v698_v44, %v697_v43 }
 0x1ed   :  { %1144 = vmatprep.mubr.msk.bf16.mxu1 %vm459_vm0, %v707_v46 }
 0x1ee   :  { %1145 = vmatmul.mubr.msk.bf16.gmra.mxu1 %vm459_vm0, %v708_v47 }
 0x1ef   :  { %1180 = vmatprep.mubr.msk.f32.mxu1 %vm1347_vm5, %v1345_v21 }
 0x294   :  { %v1764_v48 = vpop.f32.mrf.mxu1 }
 0x295   :  { %v792_v27 = vadd.f32 %v1764_v48, %v1037_v62 }
 0x296   :  { %v1766_v49 = vpop.f32.mrf.mxu1 }
 0x297   :  { %v848_v29 = vmax.f32 %v792_v27, 0.0  ;;  %v784_v31 = vadd.f32 %v1037_v62, %v1766_v49 }
 0x298   :  { %v1135_v50 = vpop.f32.mrf.mxu1 }
 0x299   :  { %v795_v26 = vadd.f32 %v1135_v50, %v1037_v62  ;;  %v846_v33 = vmax.f32 %v784_v31, 0.0 }
 0x29a   :  { %v1768_v52 = vpop.f32.mrf.mxu1 }
 0x29b   :  { %v849_v28 = vmax.f32 %v795_v26, 0.0  ;;  %v787_v30 = vadd.f32 %v1037_v62, %v1768_v52 }
 0x29c   :  { %v1138_v51 = vpop.f32.mrf.mxu1 }
 0x29d   :  { %v808_v18 = vadd.f32 %v1138_v51, %v1037_v62  ;;  %v847_v32 = vmax.f32 %v787_v30, 0.0 }
 0x29e   :  { %v799_v53 = vpop.f32.mrf.mxu1 }
 0x29f   :  { %v852_v20 = vmax.f32 %v808_v18, 0.0  ;;  %v800_v23 = vadd.f32 %v1037_v62, %v799_v53 }
 0x2a0   :  { %v1139_v54 = vpop.f32.mrf.mxu1 }
 0x2a1   :  { %v811_v16 = vadd.f32 %v1139_v54, %v1037_v62  ;;  %v850_v25 = vmax.f32 %v800_v23, 0.0 }
 0x2a2   :  { %v802_v55 = vpop.f32.mrf.mxu1 }
 0x2a3   :  { %v853_v19 = vmax.f32 %v811_v16, 0.0  ;;  %v803_v22 = vadd.f32 %v1037_v62, %v802_v55 }
 0x2a4   :  { %v1142_v56 = vpop.f32.mrf.mxu1 }
 0x2a5   :  { %v824_v10 = vadd.f32 %v1142_v56, %v1037_v62  ;;  %v851_v24 = vmax.f32 %v803_v22, 0.0 }
 0x2a6   :  { %v815_v57 = vpop.f32.mrf.mxu1 }
 0x2a7   :  { %v856_v12 = vmax.f32 %v824_v10, 0.0  ;;  %v816_v14 = vadd.f32 %v1037_v62, %v815_v57 }
 0x2a8   :  { %v1143_v58 = vpop.f32.mrf.mxu1 }
 0x2a9   :  { %v827_v8 = vadd.f32 %v1143_v58, %v1037_v62  ;;  %v854_v17 = vmax.f32 %v816_v14, 0.0 }
 0x2aa   :  { %v818_v59 = vpop.f32.mrf.mxu1 }
 0x2ab   :  { %v857_v11 = vmax.f32 %v827_v8, 0.0  ;;  %v819_v13 = vadd.f32 %v1037_v62, %v818_v59 }
 0x2ad   :  { %v855_v15 = vmax.f32 %v819_v13, 0.0 }
 0x2ae   :  { %v1146_v60 = vpop.f32.mrf.mxu1 }
 0x2af   :  { %v840_v1 = vadd.f32 %v1146_v60, %v1037_v62 }
 0x2b0   :  { %v831_v61 = vpop.f32.mrf.mxu1 }
 0x2b1   :  { %v860_v4 = vmax.f32 %v840_v1, 0.0  ;;  %v832_v6 = vadd.f32 %v1037_v62, %v831_v61 }
 0x2b2   :  { %v1147_v63 = vpop.f32.mrf.mxu1 }
 0x2b3   :  { %v843_v0 = vadd.f32 %v1147_v63, %v1037_v62  ;;  %v858_v9 = vmax.f32 %v832_v6, 0.0 }
 0x2b4   :  { %v834_v3 = vpop.f32.mrf.mxu1 }
 0x2b5   :  { %v861_v2 = vmax.f32 %v843_v0, 0.0  ;;  %v835_v5 = vadd.f32 %v1037_v62, %v834_v3 }
 0x2b7   :  { %1149 = vmatpush3.xpose.msk.msra.mxu1 %vm459_vm0, %v861_v2  ;;  %v859_v7 = vmax.f32 %v835_v5, 0.0 }
 0x2b8   :  { %1150 = vmatprep.subr.mxu1 %v1345_v21 }
 0x2bb   :  { %1151 = vmatpush3.xpose.msk.msra.mxu1 %vm459_vm0, %v860_v4 }
 0x2bc   :  { %1152 = vmatprep.subr.mxu1 %v1345_v21 }
 0x2bf   :  { %1153 = vmatpush3.xpose.msk.msra.mxu1 %vm459_vm0, %v859_v7 }
 0x2c0   :  { %1154 = vmatprep.subr.mxu1 %v1345_v21 }
 0x2c3   :  { %1155 = vmatpush3.xpose.msk.msra.mxu1 %vm459_vm0, %v858_v9 }
 0x2c4   :  { %1156 = vmatprep.subr.mxu1 %v1345_v21 }
 0x2c7   :  { %1157 = vmatpush3.xpose.msk.msra.mxu1 %vm459_vm0, %v857_v11 }
 0x2c8   :  { %1158 = vmatprep.subr.mxu1 %v1345_v21 }
 0x2cb   :  { %1159 = vmatpush3.xpose.msk.msra.mxu1 %vm459_vm0, %v856_v12 }
 0x2cc   :  { %1160 = vmatprep.subr.mxu1 %v1345_v21 }
 0x2cf   :  { %1161 = vmatpush3.xpose.msk.msra.mxu1 %vm459_vm0, %v855_v15 }
 0x2d0   :  { %1162 = vmatprep.subr.mxu1 %v1345_v21 }
 0x2d3   :  { %1163 = vmatpush3.xpose.msk.msra.mxu1 %vm459_vm0, %v854_v17 }
 0x2d4   :  { %1164 = vmatprep.subr.mxu1 %v1345_v21 }
 0x2d7   :  { %1165 = vmatpush3.xpose.msk.msra.mxu1 %vm459_vm0, %v853_v19 }
 0x2d8   :  { %1166 = vmatprep.subr.mxu1 %v1345_v21 }
 0x2db   :  { %1167 = vmatpush3.xpose.msk.msra.mxu1 %vm459_vm0, %v852_v20 }
 0x2dc   :  { %1168 = vmatprep.subr.mxu1 %v1345_v21 }
 0x2df   :  { %1169 = vmatpush3.xpose.msk.msra.mxu1 %vm459_vm0, %v851_v24 }
 0x2e0   :  { %1170 = vmatprep.subr.mxu1 %v1345_v21 }
 0x2e3   :  { %1171 = vmatpush3.xpose.msk.msra.mxu1 %vm459_vm0, %v850_v25 }
 0x2e4   :  { %1172 = vmatprep.subr.mxu1 %v1345_v21 }
 0x2e7   :  { %1173 = vmatpush3.xpose.msk.msra.mxu1 %vm459_vm0, %v849_v28 }
 0x2e8   :  { %1174 = vmatprep.subr.mxu1 %v1345_v21 }
 0x2eb   :  { %1175 = vmatpush3.xpose.msk.msra.mxu1 %vm459_vm0, %v848_v29 }
 0x2ec   :  { %1176 = vmatprep.subr.mxu1 %v1345_v21 }
 0x2ef   :  { %1177 = vmatpush3.xpose.msk.msra.mxu1 %vm459_vm0, %v847_v32 }
 0x2f0   :  { %1178 = vmatprep.subr.mxu1 %v1345_v21 }
 0x2f3   :  { %1179 = vmatpush3.xpose.msk.msra.mxu1 %vm459_vm0, %v846_v33 }
 0x2f6   :  { %1181 = vmatmul.mubr.msk.f32.vlgmr.msra.gmra.mxu1 %vm459_vm0, %v40_v34 }
 0x3b6   :  { %v979_v36 = vpop.f32.mrf.mxu1 }
 0x3b7   :  { %v988_v37 = vadd.f32 %v986_v35, %v979_v36 }
 0x3b8   :  { %v1182_v38 = vpop.f32.mrf.mxu1 }
 0x3b9   :  { %v989_v39 = vmul.f32 0.5, %v988_v37 }
 0x3bb   :  { %1318 = vtanh.f32 %v989_v39 }
 0x3c8   :  { %v1319_v40 = vpop.eup %1318 }
 0x3c9   :  { %v991_v41 = vadd.f32 1.0, %v1319_v40 }
 0x3cb   :  { %v992_v21 = vmul.f32 0.5, %v991_v41 }
 0x3cd   :  { %993 = vst [vmem:[#allocation2] sm:$0x1] %v992_v21 }
 0x3ce   :  { %1331 = shalt.err (!%p1328_p4)
}
 0x3cf   :  { %1003 = dma.vmem_to_hbm [thread:$0]  %s1001_s21, 16, %s1820_s6, [#allocation3]  }
 0x3d0   :  { %1340 = dma.done.wait [#allocation3], 16  }
 0x3d1   :  { %1341 = vsyncadd [#allocation3], 4294967280 }
 0x3d2   :  { %1007 = vsyncpa [#allocation3], 1 }

</bundles_post_ra>
